<compile_context>
chip_gen: v7x
topology: tpu7x:2x2x1
jax: 0.10.0
libtpu: 0.0.40
codegen_flags: <defaults>
</compile_context>

<pallas_src>
import functools

import jax
import jax.numpy as jnp
from jax import lax
from jax.experimental import pallas as pl
from jax.experimental.pallas import tpu as pltpu

EPS = 1e-5


def _round_up(x, m):
    return (x + m - 1) // m * m


def _pick_vmem_limit(step_bytes):
    """Request enough VMEM for the per-step working set, capped at 75% of the
    physical capacity of the current generation (64 MiB on v7x, 128 MiB on
    v5e/v6e)."""
    cap = 128 * 1024 * 1024
    try:
        info = pltpu.get_tpu_info()
        cap = int(getattr(info, "vmem_capacity_bytes", cap) or cap)
    except Exception:
        pass
    want = max(2 * int(step_bytes) + (8 << 20), 32 << 20)
    return int(min(want, (cap * 3) // 4))


# --------------------------------------------------------------------------
# Pallas kernel: one batch sample, fully fused conv block
# --------------------------------------------------------------------------
def _conv_block_kernel(x_ref, w_ref, m_ref, mask_ref, o_ref, *,
                       k, s, d, cin_pad, wph, hw_pad, cout,
                       groups, n_spatial, activation, eps):
    """Fused: k*k shifted matmuls (MXU) + bias + Group/InstanceNorm + activation.

    x_ref    : [1, s*s*cin_pad, L] (bf16/f32) phase-split, flattened padded input
    w_ref    : [k*k, Cout, cin_pad](bf16/f32) per-tap weights
    m_ref    : [Cout, 4]           (f32)      bias, gamma, beta, prelu_alpha
    mask_ref : [1, hw_pad]         (f32)      1.0 on valid output lanes
    o_ref    : [1, Cout, hw_pad]   (bf16/f32)
    """
    # In-kernel im2col: accumulate k*k shifted matmuls in f32.  Every tap is a
    # static, unit-stride 2D slice of the flat phase image (the stride handling
    # was folded into the phase layout by the wrapper).
    acc = jnp.zeros((cout, hw_pad), jnp.float32)
    for kh in range(k):
        for kw in range(k):
            a, b = kh * d, kw * d
            pidx = (a % s) * s + (b % s)          # stride phase of this tap
            off = (a // s) * wph + (b // s)       # flat lane offset of this tap
            xs = x_ref[0, pl.ds(pidx * cin_pad, cin_pad), pl.ds(off, hw_pad)]
            acc = acc + jnp.dot(w_ref[kh * k + kw], xs,
                                preferred_element_type=jnp.float32)

    y = acc + m_ref[:, 0:1]                       # bias, broadcast along lanes

    if groups is not None:
        mask = mask_ref[...]                      # [1, hw_pad]
        ym = y * mask                             # zero the garbage lanes
        gamma = m_ref[:, 1:2]
        beta = m_ref[:, 2:3]
        # Single-pass statistics: var = E[y^2] - mu^2 (clamped >= 0 below).
        if groups == 1:                           # 'ln' == GroupNorm(1, C)
            n = float(cout * n_spatial)
            mu = jnp.sum(ym) / n
            var = jnp.sum(ym * ym) / n - mu * mu
        else:
            s_c = jnp.sum(ym, axis=1, keepdims=True)        # [Cout, 1]
            ss_c = jnp.sum(ym * ym, axis=1, keepdims=True)  # [Cout, 1]
            if groups == cout:                    # 'in' == per-channel stats
                n = float(n_spatial)
                mu = s_c / n
                var = ss_c / n - mu * mu
            else:                                 # 'gn' == GroupNorm(G, C)
                cg = cout // groups
                n = float(cg * n_spatial)
                # 0/1 indicator matmuls: group reduction without the
                # [Cout,1] -> [G,cg] sublane<->lane reshape.
                ind = (lax.broadcasted_iota(jnp.int32, (groups, cout), 1) // cg
                       == lax.broadcasted_iota(jnp.int32, (groups, cout), 0)
                       ).astype(jnp.float32)                 # [G, Cout]
                ind_t = (lax.broadcasted_iota(jnp.int32, (cout, groups), 0) // cg
                         == lax.broadcasted_iota(jnp.int32, (cout, groups), 1)
                         ).astype(jnp.float32)               # [Cout, G]
                s_g = jnp.dot(ind, s_c, preferred_element_type=jnp.float32)
                ss_g = jnp.dot(ind, ss_c, preferred_element_type=jnp.float32)
                mu = jnp.dot(ind_t, s_g, preferred_element_type=jnp.float32) / n
                var = (jnp.dot(ind_t, ss_g, preferred_element_type=jnp.float32)
                       / n - mu * mu)
        var = jnp.maximum(var, 0.0)               # guard catastrophic cancel
        inv = lax.rsqrt(var + eps)
        scale = gamma * inv                       # fold gamma into rsqrt scale
        shift = beta - mu * scale
        y = y * scale + shift                     # one FMA per element

    if activation == "relu":
        y = jnp.maximum(y, 0.0)
    elif activation == "lrelu":
        y = jnp.where(y > 0, y, 0.01 * y)
    elif activation == "prelu":
        y = jnp.where(y > 0, y, m_ref[:, 3:4] * y)
    elif activation == "tanh":
        y = jnp.tanh(y)
    elif activation == "sigmoid":
        y = jax.nn.sigmoid(y)
    # activation == "none": identity

    o_ref[0] = y.astype(o_ref.dtype)


# --------------------------------------------------------------------------
# Wrapper: pad + phase-split/flatten layout plumbing + pallas_call
# --------------------------------------------------------------------------
def conv_block_forward(block, x_nchw, *, compute_dtype=jnp.bfloat16,
                       out_dtype=jnp.bfloat16):
    """ConvBlock forward.  x_nchw: [B, Cin, H, W] (any float dtype, NCHW)."""
    cfg = block["cfg"]
    k, s, p = cfg["k"], cfg["s"], cfg["p"]
    norm, act, pad_type = cfg["norm"], cfg["activation"], cfg["pad_type"]
    d = p if cfg["dilation"] else 1
    w, meta = block["w"], block["meta"]
    Cout, Cin = w.shape[0], w.shape[1]

    B, Cx, H, W = x_nchw.shape
    assert Cx == Cin, (Cx, Cin)

    # padding (nn.ReflectionPad2d / nn.ZeroPad2d); cast early -> bf16 plumbing.
    x = x_nchw.astype(compute_dtype)
    if p > 0:
        mode = "reflect" if pad_type == "mirror" else "constant"
        x = jnp.pad(x, ((0, 0), (0, 0), (p, p), (p, p)), mode=mode)
    Hp, Wp = H + 2 * p, W + 2 * p
    eff_k = d * (k - 1) + 1
    Hout = (Hp - eff_k) // s + 1
    Wout = (Wp - eff_k) // s + 1
    assert Hout > 0 and Wout > 0

    # Stride-phase split (space-to-batch): phase (ph,pw) holds x[.., ph::s, pw::s],
    # so every conv tap becomes a unit-stride window inside one phase image.
    Hph, Wph = -(-Hp // s), -(-Wp // s)
    if s > 1:
        x = jnp.pad(x, ((0, 0), (0, 0), (0, Hph * s - Hp), (0, Wph * s - Wp)))
        x = x.reshape(B, Cin, Hph, s, Wph, s).transpose(0, 3, 5, 1, 2, 4)
    else:
        x = x.reshape(B, 1, 1, Cin, Hph, Wph)

    # Contraction (Cin) padding: 8-aligned sublane starts per tap.  For bf16 the
    # review's 16-alignment is automatic whenever Cin % 16 == 0 (the common
    # case); we deliberately do not inflate tiny/odd Cin to 16 because this
    # kernel is HBM-bound and the extra zero rows would cost more than the
    # sublane packing saves.
    cin_pad = _round_up(Cin, 8)

    hw_frame = Hout * Wph                     # output lanes in the phase frame
    hw_pad = _round_up(hw_frame, 128)         # lane-dense stores / full vregs
    qmax = ((k - 1) * d) // s
    max_shift = qmax * (Wph + 1)
    L = _round_up(max(Hph * Wph, max_shift + hw_pad), 128)

    xf = jnp.pad(x, ((0, 0), (0, 0), (0, 0), (0, cin_pad - Cin), (0, 0), (0, 0)))
    xf = xf.reshape(B, s * s * cin_pad, Hph * Wph)
    xf = jnp.pad(xf, ((0, 0), (0, 0), (0, L - Hph * Wph)))

    # PyTorch weight [Cout, Cin, kh, kw] -> per-tap [k*k, Cout, cin_pad]
    wt = w.transpose(2, 3, 0, 1).reshape(k * k, Cout, Cin)
    wt = jnp.pad(wt, ((0, 0), (0, 0), (0, cin_pad - Cin))).astype(compute_dtype)

    # Validity mask over the padded phase-frame lanes (norm statistics only
    # count the Hout*Wout real output positions).
    lanes = jnp.arange(hw_pad, dtype=jnp.int32)
    mask = ((lanes < hw_frame) & (lanes % Wph < Wout)).astype(jnp.float32)[None, :]

    if norm == "none":
        groups = None
    elif norm == "in":
        groups = Cout                         # InstanceNorm == per-channel stats
    elif norm == "ln":
        groups = 1
    elif norm == "gn":
        groups = 32
        assert Cout % groups == 0, (Cout, groups)
    else:
        # TODO(synk): norm='bn' needs cross-batch statistics; not fused here.
        raise NotImplementedError(f"norm={norm!r} not supported")

    kern = functools.partial(
        _conv_block_kernel, k=k, s=s, d=d, cin_pad=cin_pad, wph=Wph,
        hw_pad=hw_pad, cout=Cout, groups=groups, n_spatial=Hout * Wout,
        activation=act, eps=EPS)

    in_isz = jnp.dtype(compute_dtype).itemsize
    out_isz = jnp.dtype(out_dtype).itemsize
    R = s * s * cin_pad
    cost = pl.CostEstimate(
        flops=2 * B * k * k * Cout * cin_pad * hw_pad + 10 * B * Cout * hw_pad,
        transcendentals=(B * Cout * hw_pad if act in ("tanh", "sigmoid") else 0),
        bytes_accessed=(xf.size * in_isz + wt.size * in_isz + meta.size * 4
                        + mask.size * 4 + B * Cout * hw_pad * out_isz),
    )
    step_bytes = (2 * R * L * in_isz + 2 * wt.size * in_isz
                  + 2 * Cout * hw_pad * out_isz + 6 * Cout * hw_pad * 4
                  + 2 * (meta.size * 4 + mask.size * 4))

    # TODO(synk): for large Hout*Wout add an HW lane-tile grid axis ("arbitrary")
    # with stats accumulated in VMEM scratch + a finalize pass (the norm needs
    # whole-sample statistics), plus a Cout tile axis for big Cout; pick the
    # tile size per generation (bigger on v5e/v6e 128 MiB VMEM, smaller on
    # v7x 64 MiB).  For tiny HW, folding B into the lane dim would further
    # amortize per-step overhead on single-TC chips.
    out = pl.pallas_call(
        kern,
        out_shape=jax.ShapeDtypeStruct((B, Cout, hw_pad), out_dtype),
        grid=(B,),
        in_specs=[
            pl.BlockSpec((1, R, L), lambda i: (i, 0, 0)),
            pl.BlockSpec((k * k, Cout, cin_pad), lambda i: (0, 0, 0)),
            pl.BlockSpec((Cout, 4), lambda i: (0, 0)),
            pl.BlockSpec((1, hw_pad), lambda i: (0, 0)),
        ],
        out_specs=pl.BlockSpec((1, Cout, hw_pad), lambda i: (i, 0, 0)),
        compiler_params=pltpu.CompilerParams(
            dimension_semantics=("parallel",),
            vmem_limit_bytes=_pick_vmem_limit(step_bytes),
        ),
        cost_estimate=cost,
    )(xf, wt, meta, mask)

    # Drop the phase-frame garbage columns / tail padding -> NCHW.
    y = out[:, :, :hw_frame].reshape(B, Cout, Hout, Wph)[:, :, :, :Wout]
    return y


# --------------------------------------------------------------------------
# Parameter construction (deterministic, PyTorch-default-like init)
# --------------------------------------------------------------------------
def make_conv_block(key, input_dim, output_dim, k, s, p, *, dilation=False,
                    norm="in", activation="relu", pad_type="mirror",
                    use_affine=True, use_bias=True):
    kw_, kb_ = jax.random.split(key)
    bound = 1.0 / float(jnp.sqrt(input_dim * k * k))
    w = jax.random.uniform(kw_, (output_dim, input_dim, k, k), jnp.float32,
                           -bound, bound)
    b = (jax.random.uniform(kb_, (output_dim,), jnp.float32, -bound, bound)
         if use_bias else jnp.zeros((output_dim,), jnp.float32))
    gamma = jnp.ones((output_dim,), jnp.float32)          # affine default init
    beta = jnp.zeros((output_dim,), jnp.float32)
    prelu_alpha = jnp.full((output_dim,), 0.25, jnp.float32)   # PReLU init
    meta = jnp.stack([b, gamma, beta, prelu_alpha], axis=1)    # [Cout, 4]
    # TODO(synk): InstanceNorm2d track_running_stats (eval-mode running stats)
    # is not modeled; train-mode per-instance statistics are used.
    del use_affine  # gamma/beta defaults are identical either way at init
    return dict(
        w=w, b=b, gamma=gamma, beta=beta, meta=meta,
        cfg=dict(k=k, s=s, p=p, dilation=dilation, norm=norm,
                 activation=activation, pad_type=pad_type),
    )


# --------------------------------------------------------------------------
# Pure-JAX reference (for correctness checking only)
# --------------------------------------------------------------------------
def conv_block_reference(block, x):
    cfg = block["cfg"]
    k, s, p = cfg["k"], cfg["s"], cfg["p"]
    norm, act, pad_type = cfg["norm"], cfg["activation"], cfg["pad_type"]
    d = p if cfg["dilation"] else 1
    x = jnp.asarray(x, jnp.float32)
    if p > 0:
        mode = "reflect" if pad_type == "mirror" else "constant"
        x = jnp.pad(x, ((0, 0), (0, 0), (p, p), (p, p)), mode=mode)
    y = lax.conv_general_dilated(
        x, block["w"], window_strides=(s, s), padding="VALID",
        rhs_dilation=(d, d), dimension_numbers=("NCHW", "OIHW", "NCHW"),
        precision=lax.Precision.HIGHEST)
    y = y + block["b"][None, :, None, None]
    if norm in ("in", "ln", "gn"):
        B, C, Hh, Ww = y.shape
        G = {"ln": 1, "gn": 32, "in": C}[norm]
        yg = y.reshape(B, G, -1)
        mu = yg.mean(axis=2, keepdims=True)
        var = ((yg - mu) ** 2).mean(axis=2, keepdims=True)
        yg = (yg - mu) * lax.rsqrt(var + EPS)
        y = (yg.reshape(B, C, Hh, Ww) * block["gamma"][None, :, None, None]
             + block["beta"][None, :, None, None])
    if act == "relu":
        y = jnp.maximum(y, 0.0)
    elif act == "lrelu":
        y = jnp.where(y > 0, y, 0.01 * y)
    elif act == "prelu":
        y = jnp.where(y > 0, y, 0.25 * y)
    elif act == "tanh":
        y = jnp.tanh(y)
    elif act == "sigmoid":
        y = jax.nn.sigmoid(y)
    return y


# --------------------------------------------------------------------------
if __name__ == "__main__":
    key = jax.random.PRNGKey(0)
    kx, k1, k2 = jax.random.split(key, 3)

    B, Cin, H, W = 2, 4, 16, 16
    x = jax.random.normal(kx, (B, Cin, H, W), jnp.float32)

    # Block 1: default ConvBlock config -> InstanceNorm ('in') + ReLU + mirror pad.
    blk1 = make_conv_block(k1, Cin, 8, k=3, s=1, p=1, norm="in", activation="relu")
    # Block 2: 'ln' (GroupNorm(1, C)) + ReLU, stride-2 downsample.
    blk2 = make_conv_block(k2, 8, 16, k=4, s=2, p=1, norm="ln", activation="relu")

    y1 = conv_block_forward(blk1, x)
    y2 = conv_block_forward(blk2, y1)
    jax.block_until_ready(y2)

    assert y1.shape == (B, 8, 16, 16), y1.shape
    assert y2.shape == (B, 16, 8, 8), y2.shape
    y1_f = y1.astype(jnp.float32)
    y2_f = y2.astype(jnp.float32)
    assert bool(jnp.all(jnp.isfinite(y1_f)))
    assert bool(jnp.all(jnp.isfinite(y2_f)))

    # bf16 MXU path + bf16 output vs f32 reference -> loose tolerance
    r1 = conv_block_reference(blk1, x)
    r2 = conv_block_reference(blk2, y1)
    assert bool(jnp.allclose(y1_f, r1, atol=7e-2, rtol=7e-2)), \
        float(jnp.max(jnp.abs(y1_f - r1)))
    assert bool(jnp.allclose(y2_f, r2, atol=7e-2, rtol=7e-2)), \
        float(jnp.max(jnp.abs(y2_f - r2)))

    print("KERNEL_OK")
</pallas_src>

<mosaic_0001>
module attributes {stable_mosaic.version = 11 : i64} {
  func.func @_conv_block_kernel(%arg0: i32, %arg1: memref<1x8x512xbf16, #tpu.memory_space<vmem>>, %arg2: memref<9x8x8xbf16, #tpu.memory_space<vmem>>, %arg3: memref<8x4xf32, #tpu.memory_space<vmem>>, %arg4: memref<1x384xf32, #tpu.memory_space<vmem>>, %arg5: memref<1x8x384xbf16, #tpu.memory_space<vmem>>) attributes {dimension_semantics = [#tpu.dimension_semantics<parallel>], iteration_bounds = array<i64: 2>, scalar_prefetch = 0 : i64, scratch_operands = 0 : i64, tpu.core_type = #tpu.core_type<tc>, window_params = [{transform_indices = @transform_0, window_bounds = array<i64: 1, 8, 512>}, {pipeline_mode = #tpu.pipeline_mode<synchronous>, transform_indices = @transform_1, window_bounds = array<i64: 9, 8, 8>}, {pipeline_mode = #tpu.pipeline_mode<synchronous>, transform_indices = @transform_2, window_bounds = array<i64: 8, 4>}, {pipeline_mode = #tpu.pipeline_mode<synchronous>, transform_indices = @transform_3, window_bounds = array<i64: 1, 384>}, {transform_indices = @transform_4, window_bounds = array<i64: 1, 8, 384>}]} {
    %cst = arith.constant 0.000000e+00 : f32
    %0 = vector.broadcast %cst : f32 to vector<8x384xf32>
    %c0 = arith.constant 0 : index
    %c0_0 = arith.constant 0 : index
    %c0_1 = arith.constant 0 : index
    %1 = vector.load %arg1[%c0, %c0_0, %c0_1] : memref<1x8x512xbf16, #tpu.memory_space<vmem>>, vector<1x8x384xbf16>
    %2 = vector.shape_cast %1 : vector<1x8x384xbf16> to vector<8x384xbf16>
    %c0_2 = arith.constant 0 : index
    %c0_3 = arith.constant 0 : index
    %c0_4 = arith.constant 0 : index
    %3 = vector.load %arg2[%c0_2, %c0_3, %c0_4] : memref<9x8x8xbf16, #tpu.memory_space<vmem>>, vector<1x8x8xbf16>
    %4 = vector.shape_cast %3 : vector<1x8x8xbf16> to vector<8x8xbf16>
    %cst_5 = arith.constant dense<0.000000e+00> : vector<8x384xf32>
    %5 = tpu.matmul %4, %2, %cst_5 {dimension_numbers = #tpu.dot_dimension_numbers<[1], [0], [0], [1], [0, 0, 1, 1], [], []>} : vector<8x8xbf16>, vector<8x384xbf16>, vector<8x384xf32> -> vector<8x384xf32>
    %6 = arith.addf %0, %5 : vector<8x384xf32>
    %c0_6 = arith.constant 0 : index
    %c0_7 = arith.constant 0 : index
    %c1 = arith.constant 1 : index
    %7 = vector.load %arg1[%c0_6, %c0_7, %c1] : memref<1x8x512xbf16, #tpu.memory_space<vmem>>, vector<1x8x384xbf16>
    %8 = vector.shape_cast %7 : vector<1x8x384xbf16> to vector<8x384xbf16>
    %c1_8 = arith.constant 1 : index
    %c0_9 = arith.constant 0 : index
    %c0_10 = arith.constant 0 : index
    %9 = vector.load %arg2[%c1_8, %c0_9, %c0_10] : memref<9x8x8xbf16, #tpu.memory_space<vmem>>, vector<1x8x8xbf16>
    %10 = vector.shape_cast %9 : vector<1x8x8xbf16> to vector<8x8xbf16>
    %cst_11 = arith.constant dense<0.000000e+00> : vector<8x384xf32>
    %11 = tpu.matmul %10, %8, %cst_11 {dimension_numbers = #tpu.dot_dimension_numbers<[1], [0], [0], [1], [0, 0, 1, 1], [], []>} : vector<8x8xbf16>, vector<8x384xbf16>, vector<8x384xf32> -> vector<8x384xf32>
    %12 = arith.addf %6, %11 : vector<8x384xf32>
    %c0_12 = arith.constant 0 : index
    %c0_13 = arith.constant 0 : index
    %c2 = arith.constant 2 : index
    %13 = vector.load %arg1[%c0_12, %c0_13, %c2] : memref<1x8x512xbf16, #tpu.memory_space<vmem>>, vector<1x8x384xbf16>
    %14 = vector.shape_cast %13 : vector<1x8x384xbf16> to vector<8x384xbf16>
    %c2_14 = arith.constant 2 : index
    %c0_15 = arith.constant 0 : index
    %c0_16 = arith.constant 0 : index
    %15 = vector.load %arg2[%c2_14, %c0_15, %c0_16] : memref<9x8x8xbf16, #tpu.memory_space<vmem>>, vector<1x8x8xbf16>
    %16 = vector.shape_cast %15 : vector<1x8x8xbf16> to vector<8x8xbf16>
    %cst_17 = arith.constant dense<0.000000e+00> : vector<8x384xf32>
    %17 = tpu.matmul %16, %14, %cst_17 {dimension_numbers = #tpu.dot_dimension_numbers<[1], [0], [0], [1], [0, 0, 1, 1], [], []>} : vector<8x8xbf16>, vector<8x384xbf16>, vector<8x384xf32> -> vector<8x384xf32>
    %18 = arith.addf %12, %17 : vector<8x384xf32>
    %c0_18 = arith.constant 0 : index
    %c0_19 = arith.constant 0 : index
    %c18 = arith.constant 18 : index
    %19 = vector.load %arg1[%c0_18, %c0_19, %c18] : memref<1x8x512xbf16, #tpu.memory_space<vmem>>, vector<1x8x384xbf16>
    %20 = vector.shape_cast %19 : vector<1x8x384xbf16> to vector<8x384xbf16>
    %c3 = arith.constant 3 : index
    %c0_20 = arith.constant 0 : index
    %c0_21 = arith.constant 0 : index
    %21 = vector.load %arg2[%c3, %c0_20, %c0_21] : memref<9x8x8xbf16, #tpu.memory_space<vmem>>, vector<1x8x8xbf16>
    %22 = vector.shape_cast %21 : vector<1x8x8xbf16> to vector<8x8xbf16>
    %cst_22 = arith.constant dense<0.000000e+00> : vector<8x384xf32>
    %23 = tpu.matmul %22, %20, %cst_22 {dimension_numbers = #tpu.dot_dimension_numbers<[1], [0], [0], [1], [0, 0, 1, 1], [], []>} : vector<8x8xbf16>, vector<8x384xbf16>, vector<8x384xf32> -> vector<8x384xf32>
    %24 = arith.addf %18, %23 : vector<8x384xf32>
    %c0_23 = arith.constant 0 : index
    %c0_24 = arith.constant 0 : index
    %c19 = arith.constant 19 : index
    %25 = vector.load %arg1[%c0_23, %c0_24, %c19] : memref<1x8x512xbf16, #tpu.memory_space<vmem>>, vector<1x8x384xbf16>
    %26 = vector.shape_cast %25 : vector<1x8x384xbf16> to vector<8x384xbf16>
    %c4 = arith.constant 4 : index
    %c0_25 = arith.constant 0 : index
    %c0_26 = arith.constant 0 : index
    %27 = vector.load %arg2[%c4, %c0_25, %c0_26] : memref<9x8x8xbf16, #tpu.memory_space<vmem>>, vector<1x8x8xbf16>
    %28 = vector.shape_cast %27 : vector<1x8x8xbf16> to vector<8x8xbf16>
    %cst_27 = arith.constant dense<0.000000e+00> : vector<8x384xf32>
    %29 = tpu.matmul %28, %26, %cst_27 {dimension_numbers = #tpu.dot_dimension_numbers<[1], [0], [0], [1], [0, 0, 1, 1], [], []>} : vector<8x8xbf16>, vector<8x384xbf16>, vector<8x384xf32> -> vector<8x384xf32>
    %30 = arith.addf %24, %29 : vector<8x384xf32>
    %c0_28 = arith.constant 0 : index
    %c0_29 = arith.constant 0 : index
    %c20 = arith.constant 20 : index
    %31 = vector.load %arg1[%c0_28, %c0_29, %c20] : memref<1x8x512xbf16, #tpu.memory_space<vmem>>, vector<1x8x384xbf16>
    %32 = vector.shape_cast %31 : vector<1x8x384xbf16> to vector<8x384xbf16>
    %c5 = arith.constant 5 : index
    %c0_30 = arith.constant 0 : index
    %c0_31 = arith.constant 0 : index
    %33 = vector.load %arg2[%c5, %c0_30, %c0_31] : memref<9x8x8xbf16, #tpu.memory_space<vmem>>, vector<1x8x8xbf16>
    %34 = vector.shape_cast %33 : vector<1x8x8xbf16> to vector<8x8xbf16>
    %cst_32 = arith.constant dense<0.000000e+00> : vector<8x384xf32>
    %35 = tpu.matmul %34, %32, %cst_32 {dimension_numbers = #tpu.dot_dimension_numbers<[1], [0], [0], [1], [0, 0, 1, 1], [], []>} : vector<8x8xbf16>, vector<8x384xbf16>, vector<8x384xf32> -> vector<8x384xf32>
    %36 = arith.addf %30, %35 : vector<8x384xf32>
    %c0_33 = arith.constant 0 : index
    %c0_34 = arith.constant 0 : index
    %c36 = arith.constant 36 : index
    %37 = vector.load %arg1[%c0_33, %c0_34, %c36] : memref<1x8x512xbf16, #tpu.memory_space<vmem>>, vector<1x8x384xbf16>
    %38 = vector.shape_cast %37 : vector<1x8x384xbf16> to vector<8x384xbf16>
    %c6 = arith.constant 6 : index
    %c0_35 = arith.constant 0 : index
    %c0_36 = arith.constant 0 : index
    %39 = vector.load %arg2[%c6, %c0_35, %c0_36] : memref<9x8x8xbf16, #tpu.memory_space<vmem>>, vector<1x8x8xbf16>
    %40 = vector.shape_cast %39 : vector<1x8x8xbf16> to vector<8x8xbf16>
    %cst_37 = arith.constant dense<0.000000e+00> : vector<8x384xf32>
    %41 = tpu.matmul %40, %38, %cst_37 {dimension_numbers = #tpu.dot_dimension_numbers<[1], [0], [0], [1], [0, 0, 1, 1], [], []>} : vector<8x8xbf16>, vector<8x384xbf16>, vector<8x384xf32> -> vector<8x384xf32>
    %42 = arith.addf %36, %41 : vector<8x384xf32>
    %c0_38 = arith.constant 0 : index
    %c0_39 = arith.constant 0 : index
    %c37 = arith.constant 37 : index
    %43 = vector.load %arg1[%c0_38, %c0_39, %c37] : memref<1x8x512xbf16, #tpu.memory_space<vmem>>, vector<1x8x384xbf16>
    %44 = vector.shape_cast %43 : vector<1x8x384xbf16> to vector<8x384xbf16>
    %c7 = arith.constant 7 : index
    %c0_40 = arith.constant 0 : index
    %c0_41 = arith.constant 0 : index
    %45 = vector.load %arg2[%c7, %c0_40, %c0_41] : memref<9x8x8xbf16, #tpu.memory_space<vmem>>, vector<1x8x8xbf16>
    %46 = vector.shape_cast %45 : vector<1x8x8xbf16> to vector<8x8xbf16>
    %cst_42 = arith.constant dense<0.000000e+00> : vector<8x384xf32>
    %47 = tpu.matmul %46, %44, %cst_42 {dimension_numbers = #tpu.dot_dimension_numbers<[1], [0], [0], [1], [0, 0, 1, 1], [], []>} : vector<8x8xbf16>, vector<8x384xbf16>, vector<8x384xf32> -> vector<8x384xf32>
    %48 = arith.addf %42, %47 : vector<8x384xf32>
    %c0_43 = arith.constant 0 : index
    %c0_44 = arith.constant 0 : index
    %c38 = arith.constant 38 : index
    %49 = vector.load %arg1[%c0_43, %c0_44, %c38] : memref<1x8x512xbf16, #tpu.memory_space<vmem>>, vector<1x8x384xbf16>
    %50 = vector.shape_cast %49 : vector<1x8x384xbf16> to vector<8x384xbf16>
    %c8 = arith.constant 8 : index
    %c0_45 = arith.constant 0 : index
    %c0_46 = arith.constant 0 : index
    %51 = vector.load %arg2[%c8, %c0_45, %c0_46] : memref<9x8x8xbf16, #tpu.memory_space<vmem>>, vector<1x8x8xbf16>
    %52 = vector.shape_cast %51 : vector<1x8x8xbf16> to vector<8x8xbf16>
    %cst_47 = arith.constant dense<0.000000e+00> : vector<8x384xf32>
    %53 = tpu.matmul %52, %50, %cst_47 {dimension_numbers = #tpu.dot_dimension_numbers<[1], [0], [0], [1], [0, 0, 1, 1], [], []>} : vector<8x8xbf16>, vector<8x384xbf16>, vector<8x384xf32> -> vector<8x384xf32>
    %54 = arith.addf %48, %53 : vector<8x384xf32>
    %c0_48 = arith.constant 0 : index
    %c0_49 = arith.constant 0 : index
    %55 = vector.load %arg3[%c0_48, %c0_49] : memref<8x4xf32, #tpu.memory_space<vmem>>, vector<8x1xf32>
    %56 = vector.broadcast %55 : vector<8x1xf32> to vector<8x384xf32>
    %57 = arith.addf %54, %56 : vector<8x384xf32>
    %c0_50 = arith.constant 0 : index
    %c0_51 = arith.constant 0 : index
    %58 = vector.load %arg4[%c0_50, %c0_51] : memref<1x384xf32, #tpu.memory_space<vmem>>, vector<1x384xf32>
    %59 = vector.broadcast %58 : vector<1x384xf32> to vector<8x384xf32>
    %60 = arith.mulf %57, %59 : vector<8x384xf32>
    %c0_52 = arith.constant 0 : index
    %c1_53 = arith.constant 1 : index
    %61 = vector.load %arg3[%c0_52, %c1_53] : memref<8x4xf32, #tpu.memory_space<vmem>>, vector<8x1xf32>
    %c0_54 = arith.constant 0 : index
    %c2_55 = arith.constant 2 : index
    %62 = vector.load %arg3[%c0_54, %c2_55] : memref<8x4xf32, #tpu.memory_space<vmem>>, vector<8x1xf32>
    %cst_56 = arith.constant dense<0.000000e+00> : vector<8xf32>
    %63 = vector.multi_reduction <add>, %60, %cst_56 [1] : vector<8x384xf32> to vector<8xf32>
    %64 = vector.shape_cast %63 : vector<8xf32> to vector<8x1xf32>
    %65 = arith.mulf %60, %60 : vector<8x384xf32>
    %cst_57 = arith.constant dense<0.000000e+00> : vector<8xf32>
    %66 = vector.multi_reduction <add>, %65, %cst_57 [1] : vector<8x384xf32> to vector<8xf32>
    %67 = vector.shape_cast %66 : vector<8xf32> to vector<8x1xf32>
    %cst_58 = arith.constant 2.560000e+02 : f32
    %68 = vector.broadcast %cst_58 : f32 to vector<8x1xf32>
    %69 = arith.divf %64, %68 : vector<8x1xf32>
    %cst_59 = arith.constant 2.560000e+02 : f32
    %70 = vector.broadcast %cst_59 : f32 to vector<8x1xf32>
    %71 = arith.divf %67, %70 : vector<8x1xf32>
    %72 = arith.mulf %69, %69 : vector<8x1xf32>
    %73 = arith.subf %71, %72 : vector<8x1xf32>
    %cst_60 = arith.constant 0.000000e+00 : f32
    %74 = vector.broadcast %cst_60 : f32 to vector<8x1xf32>
    %75 = arith.maximumf %73, %74 : vector<8x1xf32>
    %cst_61 = arith.constant 9.99999974E-6 : f32
    %76 = vector.broadcast %cst_61 : f32 to vector<8x1xf32>
    %77 = arith.addf %75, %76 : vector<8x1xf32>
    %78 = math.rsqrt %77 : vector<8x1xf32>
    %79 = arith.mulf %61, %78 : vector<8x1xf32>
    %80 = arith.mulf %69, %79 : vector<8x1xf32>
    %81 = arith.subf %62, %80 : vector<8x1xf32>
    %82 = vector.broadcast %79 : vector<8x1xf32> to vector<8x384xf32>
    %83 = arith.mulf %57, %82 : vector<8x384xf32>
    %84 = vector.broadcast %81 : vector<8x1xf32> to vector<8x384xf32>
    %85 = arith.addf %83, %84 : vector<8x384xf32>
    %cst_62 = arith.constant 0.000000e+00 : f32
    %86 = vector.broadcast %cst_62 : f32 to vector<8x384xf32>
    %87 = arith.maximumf %85, %86 : vector<8x384xf32>
    %88 = arith.truncf %87 : vector<8x384xf32> to vector<8x384xbf16>
    %c0_63 = arith.constant 0 : index
    %c0_64 = arith.constant 0 : index
    %c0_65 = arith.constant 0 : index
    %89 = vector.load %arg5[%c0_63, %c0_64, %c0_65] : memref<1x8x384xbf16, #tpu.memory_space<vmem>>, vector<1x8x384xbf16>
    %90 = vector.shape_cast %89 : vector<1x8x384xbf16> to vector<8x384xbf16>
    %91 = vector.shape_cast %88 : vector<8x384xbf16> to vector<1x8x384xbf16>
    tpu.vector_store %arg5[%c0_63, %c0_64, %c0_65], %91 {strides = array<i32>} : memref<1x8x384xbf16, #tpu.memory_space<vmem>>, vector<1x8x384xbf16>,
    return
  }
  func.func @transform_0(%arg0: i32) -> (i32, i32, i32) {
    %c0_i32 = arith.constant 0 : i32
    %c0_i32_0 = arith.constant 0 : i32
    %c0_i32_1 = arith.constant 0 : i32
    return %arg0, %c0_i32, %c0_i32_0 : i32, i32, i32
  }
  func.func @transform_1(%arg0: i32) -> (i32, i32, i32) {
    %c0_i32 = arith.constant 0 : i32
    %c0_i32_0 = arith.constant 0 : i32
    %c0_i32_1 = arith.constant 0 : i32
    %c0_i32_2 = arith.constant 0 : i32
    return %c0_i32, %c0_i32_0, %c0_i32_1 : i32, i32, i32
  }
  func.func @transform_2(%arg0: i32) -> (i32, i32) {
    %c0_i32 = arith.constant 0 : i32
    %c0_i32_0 = arith.constant 0 : i32
    %c0_i32_1 = arith.constant 0 : i32
    return %c0_i32, %c0_i32_0 : i32, i32
  }
  func.func @transform_3(%arg0: i32) -> (i32, i32) {
    %c0_i32 = arith.constant 0 : i32
    %c0_i32_0 = arith.constant 0 : i32
    %c0_i32_1 = arith.constant 0 : i32
    return %c0_i32, %c0_i32_0 : i32, i32
  }
  func.func @transform_4(%arg0: i32) -> (i32, i32, i32) {
    %c0_i32 = arith.constant 0 : i32
    %c0_i32_0 = arith.constant 0 : i32
    %c0_i32_1 = arith.constant 0 : i32
    return %arg0, %c0_i32, %c0_i32_0 : i32, i32, i32
  }
}

</mosaic_0001>

<bundles_post_ra>
// kernel: tpu_custom_call.1
= control target key start
LH: loop header
LB: loop body
LE: loop exit
PB: predicated region body
PF: predicated region fallthrough
CT: control target
= control target key end

     0   :  { %9 = vsyncpa [#allocation3], 0  ;;  %s1889_s0 = inlined_call_operand.vmem [shape: bf16[2,8,512], index: 0, kind: input, shape index: {}]   ;;  %s1890_s1 = inlined_call_operand.vmem [shape: bf16[9,8,8], index: 1, kind: input, shape index: {}]   ;;  %s1891_s2 = inlined_call_operand.vmem [shape: f32[8,4], index: 2, kind: input, shape index: {}]   ;;  %s1892_s3 = inlined_call_operand.vmem [shape: f32[1,384], index: 3, kind: input, shape index: {}]   ;;  %s1893_s4 = inlined_call_operand.hbm [shape: bf16[2,8,384], index: 4, kind: output, shape index: {}]  }
   0x1   :  { %11 = vsyncpa [#allocation3 + $0x1], 0  ;;  %s1653_s15 = smov 0   ;;  %s1655_s16 = smov 0  }
   0x2   :  { %s1657_s17 = smov 0   ;;  %s1659_s18 = smov 0  }
   0x3 LB: > { %s1674_s19 = sadd.s32 4294967295, %s1611_s18   ;;  %s1355_s20 = sadd.s32 4294967294, %s1611_s18   ;;  %s1611_s18 = sphi %s1659_s18, %s1899_s18   ;;  %s1607_s17 = sphi %s1657_s17, %s1898_s17   ;;  %s1603_s16 = sphi %s1655_s16, %s1897_s16   ;;  %s1599_s15 = sphi %s1653_s15, %s1896_s15  }
   0x4   : > { %s1678_s21 = sadd.s32 1, %s1611_s18   ;;  %s113_s22 = sadd.s32 1, %s1607_s17 }
   0x5   : > { %s110_s23 = ssub.s32 %s1611_s18, %s1678_s21  ;;  %p123_p0 = scmp.ne.s32.totalorder %s1607_s17, %s1603_s16 }
   0x6   : > { %p111_p1 = scmp.eq.s32.totalorder %s110_s23, 0  ;;  %p124_p2 = scmp.eq.s32.totalorder %s1674_s19, 1 }
   0x7   : > { %p129_p3 = scmp.ne.s32.totalorder %s1603_s16, %s1599_s15  ;;  %p130_p4 = scmp.eq.s32.totalorder %s1355_s20, 1 }
   0x8   : > { %s1689_s24 = scalar_select %p111_p1, %s1607_s17, %s113_s22  }
   0x9   : > { %p1691_p5 = por %p124_p2, %p123_p0  ;;  %p1695_p6 = por %p130_p4, %p129_p3 }
   0xa   : > { %p1358_p7 = scmp.ge.s32.totalorder %s1611_s18, 1  ;;  %p165_p8 = scmp.lt.s32.totalorder %s1611_s18, 3 }
   0xc   : > { %p166_p9 = pnand %p1358_p7, %p165_p8 }
   0xd   : > { %p191_p10 = scmp.lt.s32.totalorder (!%p166_p9), %s1674_s19, 1  ;;  %v1613_v0 = vmov (!%p166_p9), 0.0   ;;  %v1614_v1 = vmov (!%p166_p9), 0   ;;  %vm1615_vm0 = vmmov (!%p166_p9), 0   ;;  %s1616_s6 = smov (!%p166_p9), 127   ;;  %v1728_v8 = vld [vmem:[%s1891_s2] sm:$0xff] (!%p166_p9) }
   0xe   : > { %169 = sbr.rel (%p166_p9) target bundleno = 871 (0x367), region = 36  ;;  %1429 = vmatprep.subr.bf16.mxu1 (!%p166_p9), %v1613_v0  ;;  %272 = vmatprep.mubr.bf16.mxu0 (!%p166_p9), %v1614_v1  ;;  %s1617_s7 = smov (!%p166_p9), 126   ;;  %vm222_vm1 = vcmask (!%p166_p9), 1039360   ;;  %vm230_vm2 = vcmask (!%p166_p9), 1043456   ;;  %v1361_v19 = vld [vmem:[%s1890_s1 + $0x4] sm:$0xf] (!%p166_p9) }
   0xf   : > { %1431 = vmatprep.mubr.msk.bf16.mxu1 (!%p166_p9), %vm1615_vm0, %v1613_v0  ;;  %1538 = vset.pattern.permute.xlu0 (!%p166_p9), %v1614_v1  ;;  %s1618_s8 = smov (!%p166_p9), 110   ;;  %s1619_s9 = smov (!%p166_p9), 109   ;;  %vm226_vm3 = vcmask (!%p166_p9), 64512   ;;  %vm432_vm4 = vcmask (!%p166_p9), 1031168   ;;  %v199_v29 = vld [vmem:[%s1890_s1] sm:$0xf] (!%p166_p9) }
  0x10   : > { %s1620_s10 = smov (!%p166_p9), 108   ;;  %s1621_s11 = smov (!%p166_p9), 92   ;;  %vm542_vm5 = vcmask (!%p166_p9), 900096   ;;  %v1375_v39 = vld [vmem:[%s1890_s1 + $0x8] sm:$0xf] (!%p166_p9)  ;;  %vm652_vm6 = vcmask (!%p166_p9), 891904  }
  0x11   : > { %s1622_s12 = smov (!%p166_p9), 91   ;;  %s1623_s13 = smov (!%p166_p9), 90   ;;  %v1379_v49 = vld [vmem:[%s1890_s1 + $0xc] sm:$0xf] (!%p166_p9)  ;;  %vm762_vm7 = vcmask (!%p166_p9), 883712   ;;  %vm872_vm8 = vcmask (!%p166_p9), 752640  }
  0x12   : > { %v1383_v59 = vld [vmem:[%s1890_s1 + $0x10] sm:$0xf] (!%p166_p9)  ;;  %vm982_vm9 = vcmask (!%p166_p9), 744448   ;;  %vm1092_vm10 = vcmask (!%p166_p9), 736256   ;;  %s188_s29 = sand.u32 (!%p166_p9), 1, %s1603_s16  }
  0x13   : > { %s1483_s30 = smul.u32 (!%p166_p9), 12, %s188_s29 }
  0x15   : > { %s192_s27 = scalar_select %p191_p10, %s1674_s19, 1 }
  0x17   : > { %s1408_s28 = sshll.u32 %s192_s27, 4 }
  0x18   : > { %s1711_s5 = scalar_lea.vmem %s1889_s0, %s1408_s28  ;;  %s1626_s28 = smov 1  }
  0x19   : > { %v201_v2 = vld [vmem:[%s1711_s5 + $0x8] sm:$0xff]  ;;  %v200_v3 = vld [vmem:[%s1711_s5] sm:$0xff] }
  0x1a   : > { %v1364_v4 = vcombine.low %v201_v2, %v201_v2  ;;  %v1715_v5 = vcombine.low %v200_v3, %v200_v3  ;;  %v1365_v6 = vcombine.high %v201_v2, %v201_v2  ;;  %v1363_v7 = vcombine.high %v200_v3, %v200_v3  ;;  %v1546_v13 = vld [vmem:[%s1711_s5 + $0x8] ss:$0 sps:$4 sm:$0xff]   ;;  %s1484_s5 = smul.u32 192, %s1674_s19  ;;  %s1282_s19 = scalar_lea.sflag [#allocation3], %s188_s29 }
  0x1b   : > { %v339_v23 = vsel %vm230_vm2, %v1546_v13, 0 }
  0x1c   : > { %218 = vrot.lane.b32.xlu1 %v1364_v4, %s1616_s6  ;;  %214 = vrot.lane.b32.xlu0 %v1715_v5, %s1616_s6  ;;  %v333_v21 = vsel %vm230_vm2, %v1715_v5, 0 }
  0x20   : > { %220 = vrot.lane.b32.xlu1 %v1365_v6, %s1616_s6  ;;  %216 = vrot.lane.b32.xlu0 %v1363_v7, %s1616_s6  ;;  %s190_s6 = scalar_lea.vmem [#allocation2], %s1483_s30 }
  0x24   : > { %424 = vrot.lane.b32.xlu0 %v1715_v5, %s1617_s7  ;;  %426 = vrot.lane.b32.xlu1 %v1363_v7, %s1617_s7 }
  0x28   : > { %428 = vrot.lane.b32.xlu0 %v1364_v4, %s1617_s7  ;;  %430 = vrot.lane.b32.xlu1 %v1365_v6, %s1617_s7  ;;  %s1296_s7 = sshll.u32 %s190_s6, 4  ;;  %s1849_s7 = int_to_ptr.vmem [resolvable:$true] %s1296_s7 }
  0x2c   : > { %534 = vrot.lane.b32.xlu0 %v1715_v5, %s1618_s8  ;;  %536 = vrot.lane.b32.xlu1 %v1363_v7, %s1618_s8 }
  0x30   : > { %538 = vrot.lane.b32.xlu0 %v1364_v4, %s1618_s8  ;;  %540 = vrot.lane.b32.xlu1 %v1365_v6, %s1618_s8 }
  0x34   : > { %644 = vrot.lane.b32.xlu0 %v1715_v5, %s1619_s9  ;;  %646 = vrot.lane.b32.xlu1 %v1363_v7, %s1619_s9 }
  0x38   : > { %648 = vrot.lane.b32.xlu0 %v1364_v4, %s1619_s9  ;;  %650 = vrot.lane.b32.xlu1 %v1365_v6, %s1619_s9 }
  0x3c   : > { %754 = vrot.lane.b32.xlu0 %v1715_v5, %s1620_s10  ;;  %756 = vrot.lane.b32.xlu1 %v1363_v7, %s1620_s10 }
  0x40   : > { %758 = vrot.lane.b32.xlu0 %v1364_v4, %s1620_s10  ;;  %760 = vrot.lane.b32.xlu1 %v1365_v6, %s1620_s10  ;;  %s1847_s10 = scalar_lea.hbm %s1893_s4, %s1484_s5 }
  0x44   : > { %864 = vrot.lane.b32.xlu0 %v1715_v5, %s1621_s11  ;;  %866 = vrot.lane.b32.xlu1 %v1363_v7, %s1621_s11 }
  0x48   : > { %868 = vrot.lane.b32.xlu0 %v1364_v4, %s1621_s11  ;;  %870 = vrot.lane.b32.xlu1 %v1365_v6, %s1621_s11  ;;  %s1549_s11 = scalar_lea.vmem %s1849_s7, 192 }
  0x49   : > { %p1550_p11 = scmp.ne.s32.totalorder %s1849_s7, %s1549_s11 }
  0x4b   : > { %p1551_p12 = pnand %p1550_p11, %p1691_p5 }
  0x4c   : > { %974 = vrot.lane.b32.xlu0 %v1715_v5, %s1622_s12  ;;  %976 = vrot.lane.b32.xlu1 %v1363_v7, %s1622_s12 }
  0x4d   : > { %p1552_p13 = pneg %p1551_p12 }
  0x50   : > { %978 = vrot.lane.b32.xlu0 %v1364_v4, %s1622_s12  ;;  %980 = vrot.lane.b32.xlu1 %v1365_v6, %s1622_s12  ;;  %s1627_s12 = smov [#allocation2]  }
  0x54   : > { %1084 = vrot.lane.b32.xlu0 %v1715_v5, %s1623_s13  ;;  %1086 = vrot.lane.b32.xlu1 %v1363_v7, %s1623_s13 }
  0x58   : > { %1088 = vrot.lane.b32.xlu0 %v1364_v4, %s1623_s13  ;;  %1090 = vrot.lane.b32.xlu1 %v1365_v6, %s1623_s13  ;;  %s1553_s13 = sshll.u32 %s1627_s12, 4  ;;  %s1554_s13 = int_to_ptr.vmem [resolvable:$false] %s1553_s13 }
  0x59   : > { %s1555_s14 = scalar_lea.vmem %s1554_s13, 384  ;;  %p1556_p0 = scmp.lt.s32.totalorder %s1849_s7, %s1554_s13 }
  0x5a   : > { %p1557_p1 = scmp.lt.s32.totalorder %s1555_s14, %s1549_s11 }
  0x5c   : > { %1195 = vperm.xlu0 %1538, %v1728_v8   ;;  %p1558_p2 = por %p1557_p1, %p1556_p0 }
  0x5e   : > { %p1559_p3 = pnand %p1558_p2, %p1552_p13 }
  0x8e   : > { %v219_v9 = vpop.permute.xlu1 %218  ;;  %v215_v10 = vpop.permute.xlu0 %214 }
  0x92   : > { %v221_v11 = vpop.permute.xlu1 %220  ;;  %v217_v12 = vpop.permute.xlu0 %216 }
  0x93   : > { %v224_v14 = vsel %vm222_vm1, %v217_v12, %v219_v9  ;;  %v223_v15 = vsel %vm222_vm1, %v215_v10, %v217_v12  ;;  %v225_v16 = vsel %vm222_vm1, %v219_v9, %v221_v11 }
  0x94   : > { %1366 = vmatprep.subr.msk.bf16.mxu0 %vm230_vm2, %v224_v14  ;;  %v232_v17 = vsel %vm230_vm2, %v223_v15, 0  ;;  %v238_v18 = vsel %vm230_vm2, %v225_v16, 0 }
  0x95   : > { %241 = vmatpush1.bf16.msra.mxu0 %v232_v17  ;;  %1430 = vmatpush3.bf16.msra.mxu1 %v238_v18  ;;  %v1391_v18 = vld [vmem:[%s1890_s1 + $0x18] sm:$0xf] }
  0x96   : > { %1372 = vmatprep.subr.msk.bf16.mxu0 %vm230_vm2, %v1363_v7  ;;  %v425_v20 = vpop.permute.xlu0 %424  ;;  %v427_v22 = vpop.permute.xlu1 %426  ;;  %1435 = vmatprep.subr.bf16.mxu1 %v1613_v0  ;;  %v1387_v7 = vld [vmem:[%s1890_s1 + $0x14] sm:$0xf] }
  0x97   : > { %v433_v26 = vsel %vm432_vm4, %v425_v20, %v427_v22 }
  0x98   : > { %1367 = vmatmul.mubr.msk.bf16.vlgmr.msra.gmra.mrb[0].mxu0 %vm226_vm3, %v1361_v19  ;;  %1432 = vmatmul.mubr.msk.bf16.vlgmr.msra.gmra.mrb[0].mxu1 %vm226_vm3, %v1361_v19  ;;  %v440_v30 = vsel %vm230_vm2, %v433_v26, 0 }
  0x99   : > { %342 = vmatpush1.bf16.msra.mxu0 %v333_v21  ;;  %1436 = vmatpush3.bf16.msra.mxu1 %v339_v23 }
  0x9a   : > { %v429_v24 = vpop.permute.xlu0 %428  ;;  %v431_v25 = vpop.permute.xlu1 %430  ;;  %373 = vmatprep.mubr.bf16.mxu0 %v1614_v1  ;;  %1437 = vmatprep.mubr.msk.bf16.mxu1 %vm1615_vm0, %v1613_v0 }
  0x9b   : > { %v434_v27 = vsel %vm432_vm4, %v427_v22, %v429_v24  ;;  %v435_v28 = vsel %vm432_vm4, %v429_v24, %v431_v25  ;;  %1441 = vmatprep.subr.bf16.mxu1 %v1613_v0 }
  0x9c   : > { %1376 = vmatprep.subr.msk.bf16.mxu0 %vm230_vm2, %v434_v27  ;;  %v446_v31 = vsel %vm230_vm2, %v435_v28, 0  ;;  %v1395_v28 = vld [vmem:[%s1890_s1 + $0x1c] sm:$0xf] }
  0x9e   : > { %v535_v32 = vpop.permute.xlu0 %534  ;;  %v537_v33 = vpop.permute.xlu1 %536 }
  0x9f   : > { %v543_v36 = vsel %vm542_vm5, %v535_v32, %v537_v33 }
  0xa0   : > { %1373 = vmatmul.mubr.msk.bf16.vlgmr.msra.gmra.mrb[4].mxu0 %vm226_vm3, %v199_v29  ;;  %1438 = vmatmul.mubr.msk.bf16.vlgmr.msra.gmra.mrb[4].mxu1 %vm226_vm3, %v199_v29  ;;  %v550_v40 = vsel %vm230_vm2, %v543_v36, 0 }
  0xa1   : > { %449 = vmatpush1.bf16.msra.mxu0 %v440_v30  ;;  %1442 = vmatpush3.bf16.msra.mxu1 %v446_v31  ;;  %v1399_v31 = vld [vmem:[%s1890_s1 + $0x20] sm:$0xf] }
  0xa2   : > { %v539_v34 = vpop.permute.xlu0 %538  ;;  %v541_v35 = vpop.permute.xlu1 %540  ;;  %480 = vmatprep.mubr.bf16.mxu0 %v1614_v1  ;;  %1443 = vmatprep.mubr.msk.bf16.mxu1 %vm1615_vm0, %v1613_v0 }
  0xa3   : > { %v544_v37 = vsel %vm542_vm5, %v537_v33, %v539_v34  ;;  %v545_v38 = vsel %vm542_vm5, %v539_v34, %v541_v35  ;;  %1447 = vmatprep.subr.bf16.mxu1 %v1613_v0 }
  0xa4   : > { %1380 = vmatprep.subr.msk.bf16.mxu0 %vm230_vm2, %v544_v37  ;;  %v556_v41 = vsel %vm230_vm2, %v545_v38, 0 }
  0xa6   : > { %v645_v42 = vpop.permute.xlu0 %644  ;;  %v647_v43 = vpop.permute.xlu1 %646 }
  0xa7   : > { %v653_v46 = vsel %vm652_vm6, %v645_v42, %v647_v43 }
  0xa8   : > { %1377 = vmatmul.mubr.msk.bf16.vlgmr.msra.gmra.mrb[8].mxu0 %vm226_vm3, %v1375_v39  ;;  %1444 = vmatmul.mubr.msk.bf16.vlgmr.msra.gmra.mrb[8].mxu1 %vm226_vm3, %v1375_v39  ;;  %v660_v50 = vsel %vm230_vm2, %v653_v46, 0 }
  0xa9   : > { %559 = vmatpush1.bf16.msra.mxu0 %v550_v40  ;;  %1448 = vmatpush3.bf16.msra.mxu1 %v556_v41 }
  0xaa   : > { %v649_v44 = vpop.permute.xlu0 %648  ;;  %v651_v45 = vpop.permute.xlu1 %650  ;;  %590 = vmatprep.mubr.bf16.mxu0 %v1614_v1  ;;  %1449 = vmatprep.mubr.msk.bf16.mxu1 %vm1615_vm0, %v1613_v0 }
  0xab   : > { %v654_v47 = vsel %vm652_vm6, %v647_v43, %v649_v44  ;;  %v655_v48 = vsel %vm652_vm6, %v649_v44, %v651_v45  ;;  %1453 = vmatprep.subr.bf16.mxu1 %v1613_v0 }
  0xac   : > { %1384 = vmatprep.subr.msk.bf16.mxu0 %vm230_vm2, %v654_v47  ;;  %v666_v51 = vsel %vm230_vm2, %v655_v48, 0 }
  0xae   : > { %v755_v52 = vpop.permute.xlu0 %754  ;;  %v757_v53 = vpop.permute.xlu1 %756 }
  0xaf   : > { %v763_v56 = vsel %vm762_vm7, %v755_v52, %v757_v53 }
  0xb0   : > { %1381 = vmatmul.mubr.msk.bf16.vlgmr.msra.gmra.mrb[12].mxu0 %vm226_vm3, %v1379_v49  ;;  %1450 = vmatmul.mubr.msk.bf16.vlgmr.msra.gmra.mrb[12].mxu1 %vm226_vm3, %v1379_v49  ;;  %v770_v60 = vsel %vm230_vm2, %v763_v56, 0 }
  0xb1   : > { %669 = vmatpush1.bf16.msra.mxu0 %v660_v50  ;;  %1454 = vmatpush3.bf16.msra.mxu1 %v666_v51 }
  0xb2   : > { %v759_v54 = vpop.permute.xlu0 %758  ;;  %v761_v55 = vpop.permute.xlu1 %760  ;;  %700 = vmatprep.mubr.bf16.mxu0 %v1614_v1  ;;  %1455 = vmatprep.mubr.msk.bf16.mxu1 %vm1615_vm0, %v1613_v0 }
  0xb3   : > { %v764_v57 = vsel %vm762_vm7, %v757_v53, %v759_v54  ;;  %v765_v58 = vsel %vm762_vm7, %v759_v54, %v761_v55  ;;  %1459 = vmatprep.subr.bf16.mxu1 %v1613_v0 }
  0xb4   : > { %1388 = vmatprep.subr.msk.bf16.mxu0 %vm230_vm2, %v764_v57  ;;  %v776_v61 = vsel %vm230_vm2, %v765_v58, 0 }
  0xb6   : > { %v865_v62 = vpop.permute.xlu0 %864  ;;  %v867_v63 = vpop.permute.xlu1 %866 }
  0xb7   : > { %v873_v4 = vsel %vm872_vm8, %v865_v62, %v867_v63 }
  0xb8   : > { %1385 = vmatmul.mubr.msk.bf16.vlgmr.msra.gmra.mrb[16].mxu0 %vm226_vm3, %v1383_v59  ;;  %1456 = vmatmul.mubr.msk.bf16.vlgmr.msra.gmra.mrb[16].mxu1 %vm226_vm3, %v1383_v59  ;;  %v880_v9 = vsel %vm230_vm2, %v873_v4, 0 }
  0xb9   : > { %779 = vmatpush1.bf16.msra.mxu0 %v770_v60  ;;  %1460 = vmatpush3.bf16.msra.mxu1 %v776_v61 }
  0xba   : > { %v869_v2 = vpop.permute.xlu0 %868  ;;  %v871_v3 = vpop.permute.xlu1 %870  ;;  %810 = vmatprep.mubr.bf16.mxu0 %v1614_v1  ;;  %1461 = vmatprep.mubr.msk.bf16.mxu1 %vm1615_vm0, %v1613_v0 }
  0xbb   : > { %v874_v5 = vsel %vm872_vm8, %v867_v63, %v869_v2  ;;  %v875_v6 = vsel %vm872_vm8, %v869_v2, %v871_v3  ;;  %1465 = vmatprep.subr.bf16.mxu1 %v1613_v0 }
  0xbc   : > { %1392 = vmatprep.subr.msk.bf16.mxu0 %vm230_vm2, %v874_v5  ;;  %v886_v10 = vsel %vm230_vm2, %v875_v6, 0 }
  0xbe   : > { %v975_v11 = vpop.permute.xlu0 %974  ;;  %v977_v12 = vpop.permute.xlu1 %976 }
  0xbf   : > { %v983_v15 = vsel %vm982_vm9, %v975_v11, %v977_v12 }
  0xc0   : > { %1389 = vmatmul.mubr.msk.bf16.vlgmr.msra.gmra.mrb[20].mxu0 %vm226_vm3, %v1387_v7  ;;  %1462 = vmatmul.mubr.msk.bf16.vlgmr.msra.gmra.mrb[20].mxu1 %vm226_vm3, %v1387_v7  ;;  %v990_v19 = vsel %vm230_vm2, %v983_v15, 0 }
  0xc1   : > { %889 = vmatpush1.bf16.msra.mxu0 %v880_v9  ;;  %1466 = vmatpush3.bf16.msra.mxu1 %v886_v10 }
  0xc2   : > { %v979_v13 = vpop.permute.xlu0 %978  ;;  %v981_v14 = vpop.permute.xlu1 %980  ;;  %920 = vmatprep.mubr.bf16.mxu0 %v1614_v1  ;;  %1467 = vmatprep.mubr.msk.bf16.mxu1 %vm1615_vm0, %v1613_v0 }
  0xc3   : > { %v984_v16 = vsel %vm982_vm9, %v977_v12, %v979_v13  ;;  %v985_v17 = vsel %vm982_vm9, %v979_v13, %v981_v14  ;;  %1471 = vmatprep.subr.bf16.mxu1 %v1613_v0 }
  0xc4   : > { %1396 = vmatprep.subr.msk.bf16.mxu0 %vm230_vm2, %v984_v16  ;;  %v996_v20 = vsel %vm230_vm2, %v985_v17, 0 }
  0xc6   : > { %v1085_v21 = vpop.permute.xlu0 %1084  ;;  %v1087_v22 = vpop.permute.xlu1 %1086 }
  0xc7   : > { %v1093_v25 = vsel %vm1092_vm10, %v1085_v21, %v1087_v22 }
  0xc8   : > { %1393 = vmatmul.mubr.msk.bf16.vlgmr.msra.gmra.mrb[24].mxu0 %vm226_vm3, %v1391_v18  ;;  %1468 = vmatmul.mubr.msk.bf16.vlgmr.msra.gmra.mrb[24].mxu1 %vm226_vm3, %v1391_v18  ;;  %v1100_v29 = vsel %vm230_vm2, %v1093_v25, 0 }
  0xc9   : > { %999 = vmatpush1.bf16.msra.mxu0 %v990_v19  ;;  %1472 = vmatpush3.bf16.msra.mxu1 %v996_v20 }
  0xca   : > { %v1089_v23 = vpop.permute.xlu0 %1088  ;;  %v1091_v24 = vpop.permute.xlu1 %1090  ;;  %1030 = vmatprep.mubr.bf16.mxu0 %v1614_v1  ;;  %1473 = vmatprep.mubr.msk.bf16.mxu1 %vm1615_vm0, %v1613_v0 }
  0xcb   : > { %v1094_v26 = vsel %vm1092_vm10, %v1087_v22, %v1089_v23  ;;  %v1095_v27 = vsel %vm1092_vm10, %v1089_v23, %v1091_v24  ;;  %1477 = vmatprep.subr.bf16.mxu1 %v1613_v0 }
  0xcc   : > { %1400 = vmatprep.subr.msk.bf16.mxu0 %vm230_vm2, %v1094_v26  ;;  %v1106_v30 = vsel %vm230_vm2, %v1095_v27, 0 }
  0xd0   : > { %1397 = vmatmul.mubr.msk.bf16.vlgmr.msra.gmra.mrb[28].mxu0 %vm226_vm3, %v1395_v28  ;;  %1474 = vmatmul.mubr.msk.bf16.vlgmr.msra.gmra.mrb[28].mxu1 %vm226_vm3, %v1395_v28 }
  0xd1   : > { %1109 = vmatpush1.bf16.msra.mxu0 %v1100_v29  ;;  %1478 = vmatpush3.bf16.msra.mxu1 %v1106_v30 }
  0xd2   : > { %1140 = vmatprep.mubr.bf16.mxu0 %v1614_v1  ;;  %1479 = vmatprep.mubr.msk.bf16.mxu1 %vm1615_vm0, %v1613_v0 }
  0xd8   : > { %1401 = vmatmul.mubr.msk.bf16.vlgmr.msra.gmra.mrb[32].mxu0 %vm226_vm3, %v1399_v31  ;;  %1480 = vmatmul.mubr.msk.bf16.vlgmr.msra.gmra.mrb[32].mxu1 %vm226_vm3, %v1399_v31 }
 0x16b   : > { %v274_v32 = vpop.f32.mrb[0].mxu0  ;;  %v315_v33 = vpop.f32.mrb[0].mxu1 }
 0x16c   : > { %v276_v34 = vpop.f32.mrb[1].mxu0  ;;  %v1433_v35 = vpop.f32.mrb[1].mxu1 }
 0x16d   : > { %v278_v36 = vpop.f32.mrb[2].mxu0  ;;  %v318_v37 = vpop.f32.mrb[2].mxu1 }
 0x16e   : > { %v279_v38 = vpop.f32.mrb[3].mxu0  ;;  %v1434_v39 = vpop.f32.mrb[3].mxu1 }
 0x173   : > { %v375_v1 = vpop.f32.mrb[4].mxu0  ;;  %v416_v40 = vpop.f32.mrb[4].mxu1 }
 0x174   : > { %v376_v41 = vadd.f32 %v375_v1, %v274_v32  ;;  %v417_v0 = vadd.f32 %v416_v40, %v315_v33  ;;  %v377_v42 = vpop.f32.mrb[5].mxu0  ;;  %v1439_v43 = vpop.f32.mrb[5].mxu1 }
 0x175   : > { %v378_v44 = vadd.f32 %v377_v42, %v276_v34  ;;  %v379_v45 = vpop.f32.mrb[6].mxu0  ;;  %v419_v46 = vpop.f32.mrb[6].mxu1 }
 0x176   : > { %v380_v47 = vpop.f32.mrb[7].mxu0  ;;  %v1440_v48 = vpop.f32.mrb[7].mxu1 }
 0x17b   : > { %v482_v49 = vpop.f32.mrb[8].mxu0  ;;  %v523_v50 = vpop.f32.mrb[8].mxu1 }
 0x17c   : > { %v529_v51 = vadd.f32 %v482_v49, %v376_v41  ;;  %v531_v52 = vadd.f32 %v523_v50, %v417_v0  ;;  %v484_v53 = vpop.f32.mrb[9].mxu0  ;;  %v1445_v54 = vpop.f32.mrb[9].mxu1  ;;  %v1203_v0 = vlaneseq }
 0x17d   : > { %v530_v55 = vadd.f32 %v484_v53, %v378_v44  ;;  %v486_v56 = vpop.f32.mrb[10].mxu0  ;;  %v526_v57 = vpop.f32.mrb[10].mxu1 }
 0x17e   : > { %v487_v58 = vpop.f32.mrb[11].mxu0  ;;  %v1446_v59 = vpop.f32.mrb[11].mxu1  ;;  %v1204_v48 = vshrl.u32 %v1203_v0, 7 }
 0x17f   : > { %v1196_v58 = vpop.permute.xlu0 %1195 }
 0x180   : > { %v1205_v54 = vsub.s32 0, %v1204_v48  ;;  %v1209_v56 = vsub.s32 1, %v1204_v48  ;;  %v1213_v57 = vsub.s32 2, %v1204_v48 }
 0x183   : > { %v592_v60 = vpop.f32.mrb[12].mxu0  ;;  %v633_v61 = vpop.f32.mrb[12].mxu1 }
 0x184   : > { %v639_v62 = vadd.f32 %v592_v60, %v529_v51  ;;  %v641_v63 = vadd.f32 %v633_v61, %v531_v52  ;;  %v594_v2 = vpop.f32.mrb[13].mxu0  ;;  %v1451_v3 = vpop.f32.mrb[13].mxu1 }
 0x185   : > { %v640_v4 = vadd.f32 %v594_v2, %v530_v55  ;;  %v596_v5 = vpop.f32.mrb[14].mxu0  ;;  %v636_v6 = vpop.f32.mrb[14].mxu1  ;;  %v1201_v55 = vld [vmem:[%s1892_s3] sm:$0x7] }
 0x186   : > { %v597_v7 = vpop.f32.mrb[15].mxu0  ;;  %v1452_v9 = vpop.f32.mrb[15].mxu1  ;;  %v1206_v3 = vrot.slane %v1201_v55, %v1205_v54 }
 0x187   : > { %v1210_v7 = vrot.slane %v1201_v55, %v1209_v56  ;;  %v1214_v9 = vrot.slane %v1201_v55, %v1213_v57 }
 0x18b   : > { %v702_v10 = vpop.f32.mrb[16].mxu0  ;;  %v743_v11 = vpop.f32.mrb[16].mxu1 }
 0x18c   : > { %v749_v12 = vadd.f32 %v702_v10, %v639_v62  ;;  %v751_v13 = vadd.f32 %v743_v11, %v641_v63  ;;  %v704_v14 = vpop.f32.mrb[17].mxu0  ;;  %v1457_v15 = vpop.f32.mrb[17].mxu1 }
 0x18d   : > { %v750_v16 = vadd.f32 %v704_v14, %v640_v4  ;;  %v706_v17 = vpop.f32.mrb[18].mxu0  ;;  %v746_v18 = vpop.f32.mrb[18].mxu1 }
 0x18e   : > { %v707_v19 = vpop.f32.mrb[19].mxu0  ;;  %v1458_v20 = vpop.f32.mrb[19].mxu1 }
 0x193   : > { %v812_v21 = vpop.f32.mrb[20].mxu0  ;;  %v853_v22 = vpop.f32.mrb[20].mxu1 }
 0x194   : > { %v859_v23 = vadd.f32 %v812_v21, %v749_v12  ;;  %v861_v24 = vadd.f32 %v853_v22, %v751_v13  ;;  %v814_v25 = vpop.f32.mrb[21].mxu0  ;;  %v1463_v26 = vpop.f32.mrb[21].mxu1 }
 0x195   : > { %v860_v27 = vadd.f32 %v814_v25, %v750_v16  ;;  %v816_v28 = vpop.f32.mrb[22].mxu0  ;;  %v856_v29 = vpop.f32.mrb[22].mxu1  ;;  %v1624_v25 = vmov 1  }
 0x196   : > { %v817_v30 = vpop.f32.mrb[23].mxu0  ;;  %v1464_v31 = vpop.f32.mrb[23].mxu1  ;;  %1539 = vset.pattern.permute.xlu0 %v1624_v25 }
 0x19b   : > { %v922_v32 = vpop.f32.mrb[24].mxu0  ;;  %v963_v33 = vpop.f32.mrb[24].mxu1 }
 0x19c   : > { %v969_v34 = vadd.f32 %v922_v32, %v859_v23  ;;  %v971_v35 = vadd.f32 %v963_v33, %v861_v24  ;;  %v924_v36 = vpop.f32.mrb[25].mxu0  ;;  %v1469_v37 = vpop.f32.mrb[25].mxu1 }
 0x19d   : > { %v970_v38 = vadd.f32 %v924_v36, %v860_v27  ;;  %v926_v39 = vpop.f32.mrb[26].mxu0  ;;  %v966_v1 = vpop.f32.mrb[26].mxu1 }
 0x19e   : > { %v927_v40 = vpop.f32.mrb[27].mxu0  ;;  %v1470_v41 = vpop.f32.mrb[27].mxu1 }
 0x1a3   : > { %v1032_v42 = vpop.f32.mrb[28].mxu0  ;;  %v1073_v43 = vpop.f32.mrb[28].mxu1 }
 0x1a4   : > { %v1079_v44 = vadd.f32 %v1032_v42, %v969_v34  ;;  %v1081_v45 = vadd.f32 %v1073_v43, %v971_v35  ;;  %v1034_v46 = vpop.f32.mrb[29].mxu0  ;;  %v1475_v47 = vpop.f32.mrb[29].mxu1  ;;  %v1625_v34 = vmov 2  }
 0x1a5   : > { %v1080_v49 = vadd.f32 %v1034_v46, %v970_v38  ;;  %v1036_v50 = vpop.f32.mrb[30].mxu0  ;;  %v1076_v51 = vpop.f32.mrb[30].mxu1  ;;  %1540 = vset.pattern.permute.xlu1 %v1625_v34 }
 0x1a6   : > { %v1037_v52 = vpop.f32.mrb[31].mxu0  ;;  %v1476_v53 = vpop.f32.mrb[31].mxu1 }
 0x1ab   : > { %v1142_v59 = vpop.f32.mrb[32].mxu0  ;;  %v1183_v60 = vpop.f32.mrb[32].mxu1 }
 0x1ac   : > { %v1189_v61 = vadd.f32 %v1142_v59, %v1079_v44  ;;  %v1191_v62 = vadd.f32 %v1183_v60, %v1081_v45  ;;  %v1144_v63 = vpop.f32.mrb[33].mxu0  ;;  %v1481_v2 = vpop.f32.mrb[33].mxu1 }
 0x1ad   : > { %v1190_v4 = vadd.f32 %v1144_v63, %v1080_v49  ;;  %v1146_v5 = vpop.f32.mrb[34].mxu0  ;;  %v1186_v6 = vpop.f32.mrb[34].mxu1 }
 0x1ae   : > { %v1198_v10 = vadd.f32 %v1196_v58, %v1189_v61  ;;  %v1200_v11 = vadd.f32 %v1196_v58, %v1191_v62  ;;  %v1147_v12 = vpop.f32.mrb[35].mxu0  ;;  %v1482_v13 = vpop.f32.mrb[35].mxu1 }
 0x1af   : > { %v1199_v14 = vadd.f32 %v1196_v58, %v1190_v4 }
 0x1b0   : > { %v1218_v15 = vmul.f32 %v1206_v3, %v1198_v10  ;;  %v1220_v17 = vmul.f32 %v1214_v9, %v1200_v11 }
 0x1b1   : > { %v1219_v16 = vmul.f32 %v1210_v7, %v1199_v14 }
 0x1b2   : > { %v1225_v18 = vmul.f32 %v1218_v15, %v1218_v15  ;;  %v1227_v22 = vmul.f32 %v1220_v17, %v1220_v17 }
 0x1b3   : > { %v1221_v19 = vadd.f32 %v1219_v16, %v1218_v15  ;;  %v1226_v20 = vmul.f32 %v1219_v16, %v1219_v16 }
 0x1b5   : > { %v1222_v21 = vadd.f32 %v1221_v19, %v1220_v17  ;;  %v1228_v23 = vadd.f32 %v1226_v20, %v1225_v18 }
 0x1b7   : > { %1223 = vadd.xlane.f32.xlu1 %v1222_v21  ;;  %v1229_v24 = vadd.f32 %v1228_v23, %v1227_v22 }
 0x1b9   : > { %1230 = vadd.xlane.f32.xlu0 %v1229_v24 }
 0x244   : > { %v1224_v26 = vpop.xlane.xlu1 %1223 }
 0x245   : > { %v1233_v27 = vmul.f32 0.00390625, %v1224_v26 }
 0x246   : > { %v1231_v28 = vpop.xlane.xlu0 %1230 }
 0x247   : > { %v1235_v29 = vmul.f32 %v1233_v27, %v1233_v27  ;;  %v1234_v30 = vmul.f32 0.00390625, %v1231_v28 }
 0x249   : > { %v1236_v31 = vsub.f32 %v1234_v30, %v1235_v29 }
 0x24b   : > { %v1237_v32 = vmax.f32 %v1236_v31, 0.0 }
 0x24d   : > { %v1238_v33 = vadd.f32 1e-05, %v1237_v32 }
 0x24f   : > { %1547 = vrsqrt.f32 %v1238_v33 }
 0x259   : > { %v1548_v35 = vpop.eup %1547 }
 0x25a   : > { %v1240_v36 = vmul.f32 %v1548_v35, %v1728_v8 }
 0x25c   : > { %1249 = vperm.xlu0 %1539, %v1240_v36   ;;  %v1241_v37 = vmul.f32 %v1240_v36, %v1233_v27 }
 0x25e   : > { %1243 = vrot.lane.b32.xlu1 %v1241_v37, %s1626_s28 }
 0x260   : > { %1541 = vset.pattern.permute.xlu0 %v1625_v34 }
 0x2d0   : > { %v1244_v38 = vpop.permute.xlu1 %1243 }
 0x2d1   : > { %v1246_v39 = vsub.f32 %v1728_v8, %v1244_v38 }
 0x2d3   : > { %1257 = vperm.xlu1 %1540, %v1246_v39  }
 0x2db   : > { %v1250_v1 = vpop.permute.xlu0 %1249 }
 0x2dc   : > { %v1252_v40 = vmul.f32 %v1250_v1, %v1198_v10  ;;  %v1253_v41 = vmul.f32 %v1250_v1, %v1199_v14  ;;  %v1254_v0 = vmul.f32 %v1250_v1, %v1200_v11 }
 0x352   : > { %v1258_v42 = vpop.permute.xlu1 %1257 }
 0x353   : > { %v1260_v43 = vadd.f32 %v1258_v42, %v1252_v40  ;;  %v1261_v44 = vadd.f32 %v1258_v42, %v1253_v41  ;;  %v1262_v45 = vadd.f32 %v1258_v42, %v1254_v0 }
 0x355   : > { %v1263_v46 = vmax.f32 %v1260_v43, 0.0  ;;  %v1264_v47 = vmax.f32 %v1261_v44, 0.0  ;;  %v1265_v48 = vmax.f32 %v1262_v45, 0.0 }
 0x357   : > { %v1409_v49 = vpack.c.bf16 %v1264_v47, %v1263_v46  ;;  %v1410_v8 = vpack.c.bf16 %v1265_v48, %v1265_v48 }
 0x359   : > { %1280 = vst [vmem:[%s190_s6 + $0x8] sm:$0xf] %v1410_v8  ;;  %1279 = vst [vmem:[%s190_s6] sm:$0xff] %v1409_v49 }
 0x35a   : > { %1562 = shalt.err (!%p1559_p3)
}
 0x35b   : > { %s1563_s20 = scalar_lea.hbm %s1847_s10, 192  ;;  %s1567_s27 = scalar_lea.hbm %s1893_s4, 384 }
 0x35c   : > { %p1564_p4 = scmp.ne.s32.totalorder %s1847_s10, %s1563_s20  ;;  %p1568_p9 = scmp.lt.u32.totalorder %s1847_s10, %s1893_s4 }
 0x35d   : > { %p1569_p10 = scmp.lt.u32.totalorder %s1567_s27, %s1563_s20  ;;  %p1571_p12 = scmp.lt.u32.totalorder %s1563_s20, %s1847_s10 }
 0x35e   : > { %p1565_p7 = pnand %p1564_p4, %p1691_p5 }
 0x35f   : > { %p1570_p11 = por %p1569_p10, %p1568_p9 }
 0x360   : > { %p1566_p8 = pneg %p1565_p7 }
 0x361   : > { %p1572_p13 = por %p1571_p12, %p1570_p11 }
 0x363   : > { %p1573_p0 = pnand %p1572_p13, %p1566_p8 }
 0x365   : > { %1576 = shalt.err (!%p1573_p0)
}
 0x366   : > { %1485 = dma.vmem_to_hbm [thread:$0]  (%p1691_p5), %s1849_s7, 192, %s1847_s10, %s1282_s19  }
 0x367 PF: > { %p1491_p1 = scmp.ge.s32.totalorder %s1611_s18, 2  ;;  %s1308_s30 = sand.u32 1, %s1599_s15  }
 0x368   : > { %s1309_s5 = scalar_lea.sflag [#allocation3], %s1308_s30 }
 0x369   : > { %p1488_p2 = pnand %p1491_p1, %p1695_p6 }
 0x36b   : > { %1594 = dma.done.wait (!%p1488_p2), %s1309_s5, 192  }
 0x36c   : > { %1596 = vsyncadd (!%p1488_p2), %s1309_s5, 4294967104  ;;  %p14_p3 = scmp.ge.s32.totalorder %s1678_s21, 4   ;;  %s1896_s15 = smov %s1603_s16 }
 0x36d   : > { %s1897_s16 = smov %s1607_s17  ;;  %s1898_s17 = smov %s1689_s24 }
 0x36e   : > { %s1899_s18 = smov %s1678_s21  ;;  %16 = sbr.rel (!%p14_p3) target bundleno = 3 (0x3), region = 79 }
 0x375   :  { %1314 = vsyncpa [#allocation3], 1 }
 0x376   :  { %1316 = vsyncpa [#allocation3 + $0x1], 1 }

</bundles_post_ra>
